<compile_context>
chip_gen: v5e
topology: v5e:2x2
jax: 0.10.0
libtpu: 0.0.40
codegen_flags: <defaults>
</compile_context>

<pallas_src>
import numpy as np
import jax
import jax.numpy as jnp
from jax import lax
from jax.experimental import pallas as pl
from jax.experimental.pallas import tpu as pltpu

# ----------------------------------------------------------------------------
# Deterministic "parameters": the 11-tap Gaussian (sigma = 1.5), exactly as
# gaussian()/create_window() build it (normalized 1D gaussian, outer product).
# ----------------------------------------------------------------------------
WINDOW_SIZE = 11
SIGMA = 1.5
_x = np.arange(WINDOW_SIZE, dtype=np.float64)
_g = np.exp(-((_x - WINDOW_SIZE // 2) ** 2) / (2.0 * SIGMA ** 2))
GAUSS1D = (_g / _g.sum()).astype(np.float32)              # (11,), sums to 1
WIN2D = np.outer(GAUSS1D, GAUSS1D).astype(np.float32)     # for the reference
C1 = 0.01 ** 2
C2 = 0.03 ** 2
PAD = WINDOW_SIZE // 2
TILE_H = 118          # tile_h + 2*PAD = 128  (sublane / MXU friendly)
TILE_W = 246          # tile_w + 2*PAD = 256  (lane / MXU friendly)


def _banded_col_matrix(tile_h, band_hp):
    # cm[r, i] = g[i - r] for 0 <= i - r < 11 ; column pass = cm @ band
    d = np.arange(band_hp)[None, :] - np.arange(tile_h)[:, None]
    return np.where((d >= 0) & (d < WINDOW_SIZE),
                    GAUSS1D[np.clip(d, 0, WINDOW_SIZE - 1)], 0.0).astype(np.float32)


def _banded_row_matrix(band_wp, tile_w):
    # rm[c, j] = g[c - j] for 0 <= c - j < 11 ; row pass = col @ rm
    d = np.arange(band_wp)[:, None] - np.arange(tile_w)[None, :]
    return np.where((d >= 0) & (d < WINDOW_SIZE),
                    GAUSS1D[np.clip(d, 0, WINDOW_SIZE - 1)], 0.0).astype(np.float32)


def ssim_pallas(img1, img2, tile_h=TILE_H, tile_w=TILE_W):
    """SSIM(img1, img2) with window_size=11, size_average=True.  NCHW float32."""
    img1 = img1.astype(jnp.float32)
    img2 = img2.astype(jnp.float32)
    B, C, H, W = img1.shape
    G = B * C
    tile_h = max(1, min(tile_h, H))
    tile_w = max(1, min(tile_w, W))
    n_hb = (H + tile_h - 1) // tile_h
    n_wb = (W + tile_w - 1) // tile_w
    band_hp = tile_h + 2 * PAD
    band_wp = tile_w + 2 * PAD
    Hp = H + 2 * PAD
    Wp = W + 2 * PAD

    # ---- glue: zero-pad and gather overlapping (row, col) halo tiles --------
    row_start = jnp.arange(n_hb, dtype=jnp.int32) * tile_h
    rows = jnp.minimum(
        row_start[:, None] + jnp.arange(band_hp, dtype=jnp.int32)[None, :], Hp - 1)
    col_start = jnp.arange(n_wb, dtype=jnp.int32) * tile_w
    cols = jnp.minimum(
        col_start[:, None] + jnp.arange(band_wp, dtype=jnp.int32)[None, :], Wp - 1)
    # (clamped out-of-range rows/cols land on zero padding and are masked out)

    def prep(x):
        xp = jnp.pad(x.reshape(G, H, W), ((0, 0), (PAD, PAD), (PAD, PAD)))
        xb = xp[:, rows, :]            # (G, n_hb, band_hp, Wp)
        xb = xb[:, :, :, cols]         # (G, n_hb, band_hp, n_wb, band_wp)
        return jnp.transpose(xb, (0, 1, 3, 2, 4))   # (G, n_hb, n_wb, band_hp, band_wp)

    banded1 = prep(img1)
    banded2 = prep(img2)
    cmat = jnp.asarray(_banded_col_matrix(tile_h, band_hp))   # (tile_h, band_hp)
    rmat = jnp.asarray(_banded_row_matrix(band_wp, tile_w))   # (band_wp, tile_w)

    def kernel(img1_ref, img2_ref, cmat_ref, rmat_ref, out_ref):
        x1 = img1_ref[0, 0, 0]         # (band_hp, band_wp)
        x2 = img2_ref[0, 0, 0]
        cm = cmat_ref[...]
        rm = rmat_ref[...]

        def sep_conv(a):
            # column (sublane) pass then row (lane) pass, both on the MXU
            col = jnp.dot(cm, a, preferred_element_type=jnp.float32)
            return jnp.dot(col, rm, preferred_element_type=jnp.float32)

        mu1 = sep_conv(x1)
        mu2 = sep_conv(x2)
        e11 = sep_conv(x1 * x1)
        e22 = sep_conv(x2 * x2)
        e12 = sep_conv(x1 * x2)

        mu1_sq = mu1 * mu1
        mu2_sq = mu2 * mu2
        mu1_mu2 = mu1 * mu2
        sigma1_sq = e11 - mu1_sq
        sigma2_sq = e22 - mu2_sq
        sigma12 = e12 - mu1_mu2

        ssim_map = ((2.0 * mu1_mu2 + C1) * (2.0 * sigma12 + C2)) / (
            (mu1_sq + mu2_sq + C1) * (sigma1_sq + sigma2_sq + C2))

        # Ragged last bands in H and/or W: mask invalid rows/cols, partial sum.
        hb = pl.program_id(1)
        wb = pl.program_id(2)
        valid_h = jnp.minimum(H - hb * tile_h, tile_h)
        valid_w = jnp.minimum(W - wb * tile_w, tile_w)
        rid = lax.broadcasted_iota(jnp.int32, (tile_h, tile_w), 0)
        cid = lax.broadcasted_iota(jnp.int32, (tile_h, tile_w), 1)
        keep = (rid < valid_h) & (cid < valid_w)
        part = jnp.sum(jnp.where(keep, ssim_map, 0.0))
        out_ref[...] = part[None, None, None, None, None]

    n_steps = G * n_hb * n_wb
    flops_step = (10 * tile_h * band_hp * band_wp     # 5 column matmuls
                  + 10 * tile_h * band_wp * tile_w    # 5 row matmuls
                  + 3 * band_hp * band_wp             # squared/cross products
                  + 20 * tile_h * tile_w)             # SSIM elementwise tail
    cost = pl.CostEstimate(
        flops=int(n_steps * flops_step),
        transcendentals=0,
        bytes_accessed=int(2 * n_steps * band_hp * band_wp * 4))

    out = pl.pallas_call(
        kernel,
        out_shape=jax.ShapeDtypeStruct((G, n_hb, n_wb, 1, 1), jnp.float32),
        grid_spec=pltpu.PrefetchScalarGridSpec(
            num_scalar_prefetch=0,
            grid=(G, n_hb, n_wb),
            in_specs=[
                pl.BlockSpec((1, 1, 1, band_hp, band_wp),
                             lambda g, hb, wb: (g, hb, wb, 0, 0)),
                pl.BlockSpec((1, 1, 1, band_hp, band_wp),
                             lambda g, hb, wb: (g, hb, wb, 0, 0)),
                pl.BlockSpec((tile_h, band_hp), lambda g, hb, wb: (0, 0)),
                pl.BlockSpec((band_wp, tile_w), lambda g, hb, wb: (0, 0)),
            ],
            out_specs=pl.BlockSpec((1, 1, 1, 1, 1),
                                   lambda g, hb, wb: (g, hb, wb, 0, 0)),
        ),
        compiler_params=pltpu.CompilerParams(
            dimension_semantics=("parallel", "parallel", "parallel")),
        cost_estimate=cost,
    )(banded1, banded2, cmat, rmat)

    # size_average=True -> exact global mean (sum of partials / true count).
    return jnp.sum(out) / (B * C * H * W)
    # TODO(synk): size_average=False path (per-batch mean) would sum the
    # (G, n_hb, n_wb) partials per batch and divide by C*H*W instead.


# ----------------------------------------------------------------------------
# Pure-JAX reference (mirrors the PyTorch _ssim exactly) for verification.
# ----------------------------------------------------------------------------
def ssim_reference(img1, img2):
    Cn = img1.shape[1]
    w = jnp.broadcast_to(jnp.asarray(WIN2D)[None, None],
                         (Cn, 1, WINDOW_SIZE, WINDOW_SIZE))

    def conv(x):
        return lax.conv_general_dilated(
            x, w, window_strides=(1, 1),
            padding=[(PAD, PAD), (PAD, PAD)],
            feature_group_count=Cn,
            dimension_numbers=("NCHW", "OIHW", "NCHW"),
            precision=lax.Precision.HIGHEST)

    mu1, mu2 = conv(img1), conv(img2)
    mu1_sq, mu2_sq, mu1_mu2 = mu1 * mu1, mu2 * mu2, mu1 * mu2
    sigma1_sq = conv(img1 * img1) - mu1_sq
    sigma2_sq = conv(img2 * img2) - mu2_sq
    sigma12 = conv(img1 * img2) - mu1_mu2
    ssim_map = ((2 * mu1_mu2 + C1) * (2 * sigma12 + C2)) / (
        (mu1_sq + mu2_sq + C1) * (sigma1_sq + sigma2_sq + C2))
    return jnp.mean(ssim_map)


if __name__ == "__main__":
    key = jax.random.PRNGKey(0)

    # Case 1: small canonical shape (single band in H and W).
    k1, k2 = jax.random.split(key)
    B, Cn, H, W = 2, 4, 16, 16
    img1 = jax.random.uniform(k1, (B, Cn, H, W), dtype=jnp.float32)
    img2 = jax.random.uniform(k2, (B, Cn, H, W), dtype=jnp.float32)
    out = jax.block_until_ready(ssim_pallas(img1, img2))
    ref = jax.block_until_ready(ssim_reference(img1, img2))
    np.testing.assert_allclose(np.asarray(out), np.asarray(ref),
                               rtol=1e-4, atol=2e-5)

    # Case 2: ragged multi-band tiling in both H and W (exercise halo/masking).
    k3, k4 = jax.random.split(k2)
    B2, C2n, H2, W2 = 1, 3, 37, 29
    a1 = jax.random.uniform(k3, (B2, C2n, H2, W2), dtype=jnp.float32)
    a2 = jax.random.uniform(k4, (B2, C2n, H2, W2), dtype=jnp.float32)
    out2 = jax.block_until_ready(ssim_pallas(a1, a2, tile_h=16, tile_w=16))
    ref2 = jax.block_until_ready(ssim_reference(a1, a2))
    np.testing.assert_allclose(np.asarray(out2), np.asarray(ref2),
                               rtol=1e-4, atol=2e-5)

    print("KERNEL_OK")
</pallas_src>

<mosaic_0001>
module attributes {stable_mosaic.version = 11 : i64} {
  func.func @kernel(%arg0: i32, %arg1: i32, %arg2: i32, %arg3: memref<1x1x1x26x26xf32, #tpu.memory_space<vmem>>, %arg4: memref<1x1x1x26x26xf32, #tpu.memory_space<vmem>>, %arg5: memref<16x26xf32, #tpu.memory_space<vmem>>, %arg6: memref<26x16xf32, #tpu.memory_space<vmem>>, %arg7: memref<1x1x1x1x1xf32, #tpu.memory_space<vmem>>) attributes {dimension_semantics = [#tpu.dimension_semantics<parallel>, #tpu.dimension_semantics<parallel>, #tpu.dimension_semantics<parallel>], iteration_bounds = array<i64: 8, 1, 1>, scalar_prefetch = 0 : i64, scratch_operands = 0 : i64, tpu.core_type = #tpu.core_type<tc>, window_params = [{transform_indices = @transform_0, window_bounds = array<i64: 1, 1, 1, 26, 26>}, {transform_indices = @transform_1, window_bounds = array<i64: 1, 1, 1, 26, 26>}, {pipeline_mode = #tpu.pipeline_mode<synchronous>, transform_indices = @transform_2, window_bounds = array<i64: 16, 26>}, {pipeline_mode = #tpu.pipeline_mode<synchronous>, transform_indices = @transform_3, window_bounds = array<i64: 26, 16>}, {transform_indices = @transform_4, window_bounds = array<i64: 1, 1, 1, 1, 1>}]} {
    %c0 = arith.constant 0 : index
    %c0_0 = arith.constant 0 : index
    %c0_1 = arith.constant 0 : index
    %c0_2 = arith.constant 0 : index
    %c0_3 = arith.constant 0 : index
    %0 = vector.load %arg3[%c0, %c0_0, %c0_1, %c0_2, %c0_3] : memref<1x1x1x26x26xf32, #tpu.memory_space<vmem>>, vector<1x1x1x26x26xf32>
    %1 = vector.shape_cast %0 : vector<1x1x1x26x26xf32> to vector<26x26xf32>
    %c0_4 = arith.constant 0 : index
    %c0_5 = arith.constant 0 : index
    %c0_6 = arith.constant 0 : index
    %c0_7 = arith.constant 0 : index
    %c0_8 = arith.constant 0 : index
    %2 = vector.load %arg4[%c0_4, %c0_5, %c0_6, %c0_7, %c0_8] : memref<1x1x1x26x26xf32, #tpu.memory_space<vmem>>, vector<1x1x1x26x26xf32>
    %3 = vector.shape_cast %2 : vector<1x1x1x26x26xf32> to vector<26x26xf32>
    %c0_9 = arith.constant 0 : index
    %c0_10 = arith.constant 0 : index
    %4 = vector.load %arg5[%c0_9, %c0_10] : memref<16x26xf32, #tpu.memory_space<vmem>>, vector<16x26xf32>
    %c0_11 = arith.constant 0 : index
    %c0_12 = arith.constant 0 : index
    %5 = vector.load %arg6[%c0_11, %c0_12] : memref<26x16xf32, #tpu.memory_space<vmem>>, vector<26x16xf32>
    %cst = arith.constant dense<0.000000e+00> : vector<16x26xf32>
    %6 = tpu.matmul %4, %1, %cst {dimension_numbers = #tpu.dot_dimension_numbers<[1], [0], [0], [1], [0, 0, 1, 1], [], []>} : vector<16x26xf32>, vector<26x26xf32>, vector<16x26xf32> -> vector<16x26xf32>
    %cst_13 = arith.constant dense<0.000000e+00> : vector<16x16xf32>
    %7 = tpu.matmul %6, %5, %cst_13 {dimension_numbers = #tpu.dot_dimension_numbers<[1], [0], [0], [1], [0, 0, 1, 1], [], []>} : vector<16x26xf32>, vector<26x16xf32>, vector<16x16xf32> -> vector<16x16xf32>
    %cst_14 = arith.constant dense<0.000000e+00> : vector<16x26xf32>
    %8 = tpu.matmul %4, %3, %cst_14 {dimension_numbers = #tpu.dot_dimension_numbers<[1], [0], [0], [1], [0, 0, 1, 1], [], []>} : vector<16x26xf32>, vector<26x26xf32>, vector<16x26xf32> -> vector<16x26xf32>
    %cst_15 = arith.constant dense<0.000000e+00> : vector<16x16xf32>
    %9 = tpu.matmul %8, %5, %cst_15 {dimension_numbers = #tpu.dot_dimension_numbers<[1], [0], [0], [1], [0, 0, 1, 1], [], []>} : vector<16x26xf32>, vector<26x16xf32>, vector<16x16xf32> -> vector<16x16xf32>
    %10 = arith.mulf %1, %1 : vector<26x26xf32>
    %cst_16 = arith.constant dense<0.000000e+00> : vector<16x26xf32>
    %11 = tpu.matmul %4, %10, %cst_16 {dimension_numbers = #tpu.dot_dimension_numbers<[1], [0], [0], [1], [0, 0, 1, 1], [], []>} : vector<16x26xf32>, vector<26x26xf32>, vector<16x26xf32> -> vector<16x26xf32>
    %cst_17 = arith.constant dense<0.000000e+00> : vector<16x16xf32>
    %12 = tpu.matmul %11, %5, %cst_17 {dimension_numbers = #tpu.dot_dimension_numbers<[1], [0], [0], [1], [0, 0, 1, 1], [], []>} : vector<16x26xf32>, vector<26x16xf32>, vector<16x16xf32> -> vector<16x16xf32>
    %13 = arith.mulf %3, %3 : vector<26x26xf32>
    %cst_18 = arith.constant dense<0.000000e+00> : vector<16x26xf32>
    %14 = tpu.matmul %4, %13, %cst_18 {dimension_numbers = #tpu.dot_dimension_numbers<[1], [0], [0], [1], [0, 0, 1, 1], [], []>} : vector<16x26xf32>, vector<26x26xf32>, vector<16x26xf32> -> vector<16x26xf32>
    %cst_19 = arith.constant dense<0.000000e+00> : vector<16x16xf32>
    %15 = tpu.matmul %14, %5, %cst_19 {dimension_numbers = #tpu.dot_dimension_numbers<[1], [0], [0], [1], [0, 0, 1, 1], [], []>} : vector<16x26xf32>, vector<26x16xf32>, vector<16x16xf32> -> vector<16x16xf32>
    %16 = arith.mulf %1, %3 : vector<26x26xf32>
    %cst_20 = arith.constant dense<0.000000e+00> : vector<16x26xf32>
    %17 = tpu.matmul %4, %16, %cst_20 {dimension_numbers = #tpu.dot_dimension_numbers<[1], [0], [0], [1], [0, 0, 1, 1], [], []>} : vector<16x26xf32>, vector<26x26xf32>, vector<16x26xf32> -> vector<16x26xf32>
    %cst_21 = arith.constant dense<0.000000e+00> : vector<16x16xf32>
    %18 = tpu.matmul %17, %5, %cst_21 {dimension_numbers = #tpu.dot_dimension_numbers<[1], [0], [0], [1], [0, 0, 1, 1], [], []>} : vector<16x26xf32>, vector<26x16xf32>, vector<16x16xf32> -> vector<16x16xf32>
    %19 = arith.mulf %7, %7 : vector<16x16xf32>
    %20 = arith.mulf %9, %9 : vector<16x16xf32>
    %21 = arith.mulf %7, %9 : vector<16x16xf32>
    %22 = arith.subf %12, %19 : vector<16x16xf32>
    %23 = arith.subf %15, %20 : vector<16x16xf32>
    %24 = arith.subf %18, %21 : vector<16x16xf32>
    %cst_22 = arith.constant 2.000000e+00 : f32
    %25 = vector.broadcast %cst_22 : f32 to vector<16x16xf32>
    %26 = arith.mulf %25, %21 : vector<16x16xf32>
    %cst_23 = arith.constant 9.99999974E-5 : f32
    %27 = vector.broadcast %cst_23 : f32 to vector<16x16xf32>
    %28 = arith.addf %26, %27 : vector<16x16xf32>
    %cst_24 = arith.constant 2.000000e+00 : f32
    %29 = vector.broadcast %cst_24 : f32 to vector<16x16xf32>
    %30 = arith.mulf %29, %24 : vector<16x16xf32>
    %cst_25 = arith.constant 8.99999984E-4 : f32
    %31 = vector.broadcast %cst_25 : f32 to vector<16x16xf32>
    %32 = arith.addf %30, %31 : vector<16x16xf32>
    %33 = arith.mulf %28, %32 : vector<16x16xf32>
    %34 = arith.addf %19, %20 : vector<16x16xf32>
    %cst_26 = arith.constant 9.99999974E-5 : f32
    %35 = vector.broadcast %cst_26 : f32 to vector<16x16xf32>
    %36 = arith.addf %34, %35 : vector<16x16xf32>
    %37 = arith.addf %22, %23 : vector<16x16xf32>
    %cst_27 = arith.constant 8.99999984E-4 : f32
    %38 = vector.broadcast %cst_27 : f32 to vector<16x16xf32>
    %39 = arith.addf %37, %38 : vector<16x16xf32>
    %40 = arith.mulf %36, %39 : vector<16x16xf32>
    %41 = arith.divf %33, %40 : vector<16x16xf32>
    %c16_i32 = arith.constant 16 : i32
    %42 = arith.muli %arg1, %c16_i32 : i32
    %c16_i32_28 = arith.constant 16 : i32
    %43 = arith.subi %c16_i32_28, %42 : i32
    %c16_i32_29 = arith.constant 16 : i32
    %44 = arith.minsi %43, %c16_i32_29 : i32
    %c16_i32_30 = arith.constant 16 : i32
    %45 = arith.muli %arg2, %c16_i32_30 : i32
    %c16_i32_31 = arith.constant 16 : i32
    %46 = arith.subi %c16_i32_31, %45 : i32
    %c16_i32_32 = arith.constant 16 : i32
    %47 = arith.minsi %46, %c16_i32_32 : i32
    %48 = tpu.iota {dimensions = array<i32: 0>} : vector<16x16xi32>
    %49 = tpu.iota {dimensions = array<i32: 1>} : vector<16x16xi32>
    %50 = vector.broadcast %44 : i32 to vector<16x16xi32>
    %51 = arith.cmpi slt, %48, %50 : vector<16x16xi32>
    %52 = vector.broadcast %47 : i32 to vector<16x16xi32>
    %53 = arith.cmpi slt, %49, %52 : vector<16x16xi32>
    %54 = arith.andi %51, %53 : vector<16x16xi1>
    %cst_33 = arith.constant 0.000000e+00 : f32
    %55 = vector.broadcast %cst_33 : f32 to vector<16x16xf32>
    %56 = arith.select %54, %41, %55 : vector<16x16xi1>, vector<16x16xf32>
    %57 = vector.shape_cast %56 : vector<16x16xf32> to vector<1x16x16xf32>
    %cst_34 = arith.constant dense<0.000000e+00> : vector<1xf32>
    %58 = vector.multi_reduction <add>, %57, %cst_34 [1, 2] : vector<1x16x16xf32> to vector<1xf32>
    %59 = vector.shape_cast %58 : vector<1xf32> to vector<1x1x1xf32>
    %60 = vector.extract %59[0, 0, 0] : f32 from vector<1x1x1xf32>
    %61 = vector.broadcast %60 : f32 to vector<1x1x1x1x1xf32>
    %c0_35 = arith.constant 0 : index
    %c0_36 = arith.constant 0 : index
    %c0_37 = arith.constant 0 : index
    %c0_38 = arith.constant 0 : index
    %c0_39 = arith.constant 0 : index
    %62 = vector.load %arg7[%c0_35, %c0_36, %c0_37, %c0_38, %c0_39] : memref<1x1x1x1x1xf32, #tpu.memory_space<vmem>>, vector<1x1x1x1x1xf32>
    tpu.vector_store %arg7[%c0_35, %c0_36, %c0_37, %c0_38, %c0_39], %61 {strides = array<i32>} : memref<1x1x1x1x1xf32, #tpu.memory_space<vmem>>, vector<1x1x1x1x1xf32>,
    return
  }
  func.func @transform_0(%arg0: i32, %arg1: i32, %arg2: i32) -> (i32, i32, i32, i32, i32) {
    %c0_i32 = arith.constant 0 : i32
    %c0_i32_0 = arith.constant 0 : i32
    %c0_i32_1 = arith.constant 0 : i32
    return %arg0, %arg1, %arg2, %c0_i32, %c0_i32_0 : i32, i32, i32, i32, i32
  }
  func.func @transform_1(%arg0: i32, %arg1: i32, %arg2: i32) -> (i32, i32, i32, i32, i32) {
    %c0_i32 = arith.constant 0 : i32
    %c0_i32_0 = arith.constant 0 : i32
    %c0_i32_1 = arith.constant 0 : i32
    return %arg0, %arg1, %arg2, %c0_i32, %c0_i32_0 : i32, i32, i32, i32, i32
  }
  func.func @transform_2(%arg0: i32, %arg1: i32, %arg2: i32) -> (i32, i32) {
    %c0_i32 = arith.constant 0 : i32
    %c0_i32_0 = arith.constant 0 : i32
    %c0_i32_1 = arith.constant 0 : i32
    return %c0_i32, %c0_i32_0 : i32, i32
  }
  func.func @transform_3(%arg0: i32, %arg1: i32, %arg2: i32) -> (i32, i32) {
    %c0_i32 = arith.constant 0 : i32
    %c0_i32_0 = arith.constant 0 : i32
    %c0_i32_1 = arith.constant 0 : i32
    return %c0_i32, %c0_i32_0 : i32, i32
  }
  func.func @transform_4(%arg0: i32, %arg1: i32, %arg2: i32) -> (i32, i32, i32, i32, i32) {
    %c0_i32 = arith.constant 0 : i32
    %c0_i32_0 = arith.constant 0 : i32
    %c0_i32_1 = arith.constant 0 : i32
    return %arg0, %arg1, %arg2, %c0_i32, %c0_i32_0 : i32, i32, i32, i32, i32
  }
}

</mosaic_0001>

<bundles_post_ra>
// kernel: tpu_custom_call.1
= control target key start
LH: loop header
LB: loop body
LE: loop exit
PB: predicated region body
PF: predicated region fallthrough
CT: control target
= control target key end

     0   :  { %s967_s15 = smov 0   ;;  %s969_s16 = smov 0   ;;  %s1073_s0 = inlined_call_operand.vmem [shape: f32[8,1,1,26,26], index: 0, kind: input, shape index: {}]   ;;  %s1074_s1 = inlined_call_operand.vmem [shape: f32[8,1,1,26,26], index: 1, kind: input, shape index: {}]   ;;  %s1075_s2 = inlined_call_operand.vmem [shape: f32[16,26], index: 2, kind: input, shape index: {}]   ;;  %s1076_s3 = inlined_call_operand.vmem [shape: f32[26,16], index: 3, kind: input, shape index: {}]   ;;  %s1077_s4 = inlined_call_operand.vmem [shape: f32[8,1,1,1,1], index: 4, kind: output, shape index: {}]  }
   0x1   :  { %s971_s17 = smov 0  }
   0x2 LB: > { %s33_s18 = sadd.s32 1, %s936_s16  ;;  %p841_p0 = scmp.ge.s32.totalorder %s940_s17, 1  ;;  %s940_s17 = sphi %s971_s17, %s14_s17   ;;  %s936_s16 = sphi %s969_s16, %s1079_s16   ;;  %s932_s15 = sphi %s967_s15, %s1078_s15  }
   0x3   : > { %p35_p1 = scmp.ge.s32.totalorder %s33_s18, 8  ;;  %p219_p2 = scmp.lt.s32.totalorder %s940_s17, 9 }
   0x5   : > { %s1081_s18 = smov (%p35_p1, %s33_s18), 0  ;;  %p220_p3 = pnand %p841_p0, %p219_p2 }
   0x6   : > { %p270_p4 = scmp.lt.s32.totalorder (!%p220_p3), %s932_s15, 7 }
   0x7   : > { %223 = sbr.rel (%p220_p3) target bundleno = 530 (0x212), region = 36 }
   0xc   : > { %s1083_s15 = smov (!%p270_p4, %s932_s15), 7  ;;  %vm326_vm0 = vcmask 1041408   ;;  %v313_v4 = vld [vmem:[%s1075_s2] sm:$0xff]  ;;  %vm319_vm1 = vcmask 211968   ;;  %v314_v5 = vld [vmem:[%s1075_s2 + $0x8] sm:$0xff]  ;;  %v1014_v12 = vld [vmem:[%s1076_s3 + $0x10] sm:$0xff] }
   0xd   : > { %s878_s19 = sshll.u32 %s1083_s15, 5  ;;  %v1007_v10 = vld [vmem:[%s1076_s3 + $0x18] sm:$0x3]  ;;  %v316_v15 = vld [vmem:[%s1076_s3 + $0x8] sm:$0xff]  ;;  %v315_v25 = vld [vmem:[%s1076_s3] sm:$0xff]  ;;  %vm701_vm11 = vcmask 130048   ;;  %s304_s14 = scalar_lea.vmem %s1077_s4, %s1083_s15 }
   0xe   : > { %s282_s22 = scalar_lea.vmem %s1073_s0, %s878_s19  ;;  %s295_s25 = scalar_lea.vmem %s1074_s1, %s878_s19  ;;  %849 = vmatpush.msk.msra.mxu1 %vm326_vm0, %v1007_v10  ;;  %884 = vmatpush.msk.msra.mxu3 %vm326_vm0, %v1007_v10  ;;  %vm715_vm12 = vcmask 0  }
   0xf   : > { %v308_v0 = vld [vmem:[%s282_s22 + $0x18] sm:$0x3]  ;;  %v307_v1 = vld [vmem:[%s282_s22 + $0x10] sm:$0xff]  ;;  %v306_v2 = vld [vmem:[%s282_s22 + $0x8] sm:$0xff] }
  0x10   : > { %846 = vmatpush.msk.msra.mxu0 %vm326_vm0, %v308_v0  ;;  %880 = vmatpush.msk.msra.mxu2 %vm326_vm0, %v308_v0  ;;  %v305_v3 = vld [vmem:[%s282_s22] sm:$0xff]  ;;  %v443_v6 = vmul.f32 %v308_v0, %v308_v0  ;;  %v312_v7 = vld [vmem:[%s295_s25 + $0x18] sm:$0x3]  ;;  %v442_v8 = vmul.f32 %v307_v1, %v307_v1  ;;  %v311_v9 = vld [vmem:[%s295_s25 + $0x10] sm:$0xff]  ;;  %v441_v11 = vmul.f32 %v306_v2, %v306_v2 }
  0x11   : > { %v310_v13 = vld [vmem:[%s295_s25 + $0x8] sm:$0xff]  ;;  %v440_v14 = vmul.f32 %v305_v3, %v305_v3  ;;  %v309_v16 = vld [vmem:[%s295_s25] sm:$0xff]  ;;  %375 = vmatpush.msra.mxu1 %v1014_v12  ;;  %885 = vmatpush.msra.mxu3 %v1014_v12  ;;  %v502_v17 = vmul.f32 %v312_v7, %v312_v7  ;;  %v561_v18 = vmul.f32 %v312_v7, %v308_v0 }
  0x12   : > { %343 = vmatpush.msra.mxu0 %v307_v1  ;;  %881 = vmatpush.msra.mxu2 %v307_v1  ;;  %v501_v19 = vmul.f32 %v311_v9, %v311_v9  ;;  %v560_v20 = vmul.f32 %v311_v9, %v307_v1  ;;  %v500_v21 = vmul.f32 %v310_v13, %v310_v13 }
  0x13   : > { %376 = vmatpush.msra.mxu1 %v316_v15  ;;  %886 = vmatpush.msra.mxu3 %v316_v15  ;;  %v559_v22 = vmul.f32 %v310_v13, %v306_v2  ;;  %v499_v23 = vmul.f32 %v309_v16, %v309_v16  ;;  %v558_v24 = vmul.f32 %v309_v16, %v305_v3 }
  0x14   : > { %344 = vmatpush.msra.mxu0 %v306_v2  ;;  %882 = vmatpush.msra.mxu2 %v306_v2 }
  0x15   : > { %377 = vmatpush.msra.mxu1 %v315_v25  ;;  %887 = vmatpush.msra.mxu3 %v315_v25 }
  0x16   : > { %345 = vmatpush.msra.mxu0 %v305_v3  ;;  %883 = vmatpush.msra.mxu2 %v305_v3 }
  0x17   : > { %847 = vmatmul.msk.f32.vlgmr.msra.gmra.mxu0 %vm319_vm1, %v313_v4  ;;  %848 = vmatmul.msk.f32.vlgmr.msra.gmra.mxu2 %vm319_vm1, %v314_v5 }
  0x18   : > { %852 = vmatpush.msk.msrb.mxu2 %vm326_vm0, %v312_v7  ;;  %858 = vmatpush.msk.msrb.mxu0 %vm326_vm0, %v443_v6 }
  0x19   : > { %861 = vmatpush.msk.msrb.mxu1 %vm326_vm0, %v1007_v10  ;;  %855 = vmatpush.msk.msrb.mxu3 %vm326_vm0, %v1007_v10 }
  0x1a   : > { %401 = vmatpush.msrb.mxu2 %v311_v9  ;;  %460 = vmatpush.msrb.mxu0 %v442_v8 }
  0x1b   : > { %489 = vmatpush.msrb.mxu1 %v1014_v12  ;;  %430 = vmatpush.msrb.mxu3 %v1014_v12 }
  0x1c   : > { %402 = vmatpush.msrb.mxu2 %v310_v13  ;;  %461 = vmatpush.msrb.mxu0 %v441_v11 }
  0x1d   : > { %490 = vmatpush.msrb.mxu1 %v316_v15  ;;  %431 = vmatpush.msrb.mxu3 %v316_v15 }
  0x1e   : > { %403 = vmatpush.msrb.mxu2 %v309_v16  ;;  %462 = vmatpush.msrb.mxu0 %v440_v14 }
  0x1f   : > { %853 = vmatmul.msk.f32.vlgmr.msrb.gmra.mxu2 %vm319_vm1, %v313_v4  ;;  %859 = vmatmul.msk.f32.vlgmr.msrb.gmra.mxu0 %vm319_vm1, %v313_v4 }
  0x20   : > { %864 = vmatpush.msk.msra.mxu2 %vm326_vm0, %v502_v17  ;;  %870 = vmatpush.msk.msra.mxu0 %vm326_vm0, %v561_v18 }
  0x21   : > { %491 = vmatpush.msrb.mxu1 %v315_v25  ;;  %432 = vmatpush.msrb.mxu3 %v315_v25 }
  0x22   : > { %519 = vmatpush.msra.mxu2 %v501_v19  ;;  %578 = vmatpush.msra.mxu0 %v560_v20 }
  0x24   : > { %520 = vmatpush.msra.mxu2 %v500_v21  ;;  %579 = vmatpush.msra.mxu0 %v559_v22 }
  0x26   : > { %521 = vmatpush.msra.mxu2 %v499_v23  ;;  %580 = vmatpush.msra.mxu0 %v558_v24 }
  0x27   : > { %854 = vmatmul.msk.f32.gmra.mxu2 %vm319_vm1, %v314_v5  ;;  %860 = vmatmul.msk.f32.gmra.mxu0 %vm319_vm1, %v314_v5 }
  0x2f   : > { %865 = vmatmul.msk.f32.vlgmr.msra.gmra.mxu2 %vm319_vm1, %v313_v4  ;;  %871 = vmatmul.msk.f32.vlgmr.msra.gmra.mxu0 %vm319_vm1, %v313_v4 }
  0x37   : > { %866 = vmatmul.msk.f32.gmra.mxu2 %vm319_vm1, %v314_v5  ;;  %872 = vmatmul.msk.f32.gmra.mxu0 %vm319_vm1, %v314_v5 }
  0x94   : > { %v347_v26 = vpop.f32.mrf.mxu0 }
  0x95   : > { %850 = vmatmul.msk.f32.vlgmr.msra.gmra.mxu1 %vm319_vm1, %v347_v26 }
  0x96   : > { %873 = vmatpush.msk.msra.mxu1 %vm326_vm0, %v1007_v10 }
  0x98   : > { %607 = vmatpush.msra.mxu1 %v1014_v12 }
  0x9a   : > { %v350_v27 = vpop.f32.mrf.mxu2  ;;  %608 = vmatpush.msra.mxu1 %v316_v15 }
  0x9b   : > { %851 = vmatmul.msk.f32.vlgmr.msra.gmra.mxu3 %vm319_vm1, %v350_v27 }
  0x9c   : > { %v464_v28 = vpop.f32.mrf.mxu0  ;;  %867 = vmatpush.msk.msra.mxu3 %vm326_vm0, %v1007_v10  ;;  %609 = vmatpush.msra.mxu1 %v315_v25 }
  0x9d   : > { %862 = vmatmul.msk.f32.vlgmr.msrb.gmra.mxu1 %vm319_vm1, %v464_v28 }
  0x9e   : > { %548 = vmatpush.msra.mxu3 %v1014_v12 }
  0xa0   : > { %549 = vmatpush.msra.mxu3 %v316_v15  ;;  %v690_v15 = vlaneseq }
  0xa2   : > { %v405_v29 = vpop.f32.mrf.mxu2  ;;  %550 = vmatpush.msra.mxu3 %v315_v25  ;;  %v691_v26 = vand.u32 127, %v690_v15 }
  0xa3   : > { %856 = vmatmul.msk.f32.vlgmr.msrb.gmra.mxu3 %vm319_vm1, %v405_v29 }
  0xa4   : > { %v467_v30 = vpop.f32.mrf.mxu0  ;;  %vm696_vm9 = vcmp.lt.s32.totalorder %v691_v26, 16 }
  0xa5   : > { %863 = vmatmul.msk.f32.gmra.mxu1 %vm319_vm1, %v467_v30 }
  0xaa   : > { %v408_v31 = vpop.f32.mrf.mxu2 }
  0xab   : > { %857 = vmatmul.msk.f32.gmra.mxu3 %vm319_vm1, %v408_v31 }
  0xac   : > { %v582_v32 = vpop.f32.mrf.mxu0 }
  0xad   : > { %874 = vmatmul.msk.f32.vlgmr.msra.gmra.mxu1 %vm319_vm1, %v582_v32 }
  0xb2   : > { %v523_v33 = vpop.f32.mrf.mxu2 }
  0xb3   : > { %868 = vmatmul.msk.f32.vlgmr.msra.gmra.mxu3 %vm319_vm1, %v523_v33 }
  0xb4   : > { %v585_v34 = vpop.f32.mrf.mxu0 }
  0xb5   : > { %875 = vmatmul.msk.f32.gmra.mxu1 %vm319_vm1, %v585_v34 }
  0xba   : > { %v526_v35 = vpop.f32.mrf.mxu2 }
  0xbb   : > { %869 = vmatmul.msk.f32.gmra.mxu3 %vm319_vm1, %v526_v35 }
 0x112   : > { %v379_v37 = vpop.f32.mrf.mxu1 }
 0x113   : > { %v617_v41 = vmul.f32 %v379_v37, %v379_v37 }
 0x11a   : > { %v493_v39 = vpop.f32.mrf.mxu1 }
 0x11b   : > { %v623_v45 = vsub.f32 %v493_v39, %v617_v41 }
 0x11e   : > { %v382_v36 = vpop.f32.mrf.mxu3 }
 0x11f   : > { %v618_v52 = vmul.f32 %v382_v36, %v382_v36 }
 0x122   : > { %v496_v42 = vpop.f32.mrf.mxu1 }
 0x123   : > { %v624_v56 = vsub.f32 %v496_v42, %v618_v52 }
 0x126   : > { %v434_v38 = vpop.f32.mrf.mxu3 }
 0x127   : > { %v619_v43 = vmul.f32 %v434_v38, %v434_v38  ;;  %v621_v60 = vmul.f32 %v434_v38, %v379_v37 }
 0x129   : > { %v639_v46 = vadd.f32 %v619_v43, %v617_v41  ;;  %v629_v9 = vmul.f32 2.0, %v621_v60 }
 0x12a   : > { %v611_v53 = vpop.f32.mrf.mxu1 }
 0x12b   : > { %v641_v49 = vadd.f32 0.0001, %v639_v46  ;;  %v627_v0 = vsub.f32 %v611_v53, %v621_v60  ;;  %v631_v19 = vadd.f32 0.0001, %v629_v9 }
 0x12d   : > { %v633_v6 = vmul.f32 2.0, %v627_v0 }
 0x12e   : > { %v437_v40 = vpop.f32.mrf.mxu3 }
 0x12f   : > { %v620_v50 = vmul.f32 %v437_v40, %v437_v40  ;;  %v622_v4 = vmul.f32 %v437_v40, %v382_v36  ;;  %v635_v14 = vadd.f32 0.0009, %v633_v6 }
 0x131   : > { %v640_v57 = vadd.f32 %v620_v50, %v618_v52  ;;  %v630_v21 = vmul.f32 2.0, %v622_v4  ;;  %v637_v23 = vmul.f32 %v635_v14, %v631_v19 }
 0x132   : > { %v614_v3 = vpop.f32.mrf.mxu1 }
 0x133   : > { %v642_v61 = vadd.f32 0.0001, %v640_v57  ;;  %v628_v7 = vsub.f32 %v614_v3, %v622_v4  ;;  %v632_v30 = vadd.f32 0.0001, %v630_v21 }
 0x135   : > { %v634_v16 = vmul.f32 2.0, %v628_v7 }
 0x136   : > { %v552_v44 = vpop.f32.mrf.mxu3 }
 0x137   : > { %v625_v47 = vsub.f32 %v552_v44, %v619_v43  ;;  %v636_v27 = vadd.f32 0.0009, %v634_v16 }
 0x139   : > { %v643_v48 = vadd.f32 %v625_v47, %v623_v45  ;;  %v638_v34 = vmul.f32 %v636_v27, %v632_v30 }
 0x13b   : > { %v645_v51 = vadd.f32 0.0009, %v643_v48 }
 0x13d   : > { %v647_v54 = vmul.f32 %v645_v51, %v641_v49 }
 0x13e   : > { %v555_v55 = vpop.f32.mrf.mxu3 }
 0x13f   : > { %914 = vrcp.f32 %v647_v54  ;;  %v626_v58 = vsub.f32 %v555_v55, %v620_v50  ;;  %v660_v10 = vand.u32 2147483648, %v647_v54  ;;  %vm654_vm3 = vweird.f32 %v647_v54 }
 0x140   : > { %v658_v12 = vand.u32 2147483647, %v647_v54 }
 0x141   : > { %v644_v59 = vadd.f32 %v626_v58, %v624_v56  ;;  %v661_v20 = vor.u32 1.1754944e-38, %v660_v10 }
 0x142   : > { %vm659_vm5 = vcmp.eq.f32.partialorder %v658_v12, 8.507059e+37 }
 0x143   : > { %v646_v62 = vadd.f32 0.0009, %v644_v59 }
 0x145   : > { %v915_v63 = vpop.eup %914  ;;  %v648_v1 = vmul.f32 %v646_v62, %v642_v61 }
 0x146   : > { %v650_v2 = vmul.f32 %v915_v63, %v647_v54  ;;  %vm655_vm2 = vweird.f32 %v915_v63 }
 0x147   : > { %916 = vrcp.f32 %v648_v1  ;;  %vm656_vm4 = vmor %vm654_vm3, %vm655_vm2  ;;  %v675_v25 = vand.u32 2147483648, %v648_v1  ;;  %v673_v29 = vand.u32 2147483647, %v648_v1  ;;  %vm669_vm7 = vweird.f32 %v648_v1 }
 0x148   : > { %v651_v5 = vsub.f32 1.0, %v650_v2 }
 0x149   : > { %v676_v33 = vor.u32 1.1754944e-38, %v675_v25  ;;  %vm674_vm10 = vcmp.eq.f32.partialorder %v673_v29, 8.507059e+37 }
 0x14a   : > { %v652_v8 = vmul.f32 %v915_v63, %v651_v5 }
 0x14c   : > { %v653_v11 = vadd.f32 %v915_v63, %v652_v8 }
 0x14d   : > { %v917_v13 = vpop.eup %916 }
 0x14e   : > { %v657_v17 = vsel %vm656_vm4, %v915_v63, %v653_v11  ;;  %v665_v18 = vmul.f32 %v917_v13, %v648_v1  ;;  %vm670_vm6 = vweird.f32 %v917_v13 }
 0x14f   : > { %v662_v24 = vsel %vm659_vm5, %v661_v20, %v657_v17  ;;  %vm671_vm8 = vmor %vm669_vm7, %vm670_vm6 }
 0x150   : > { %v666_v22 = vsub.f32 1.0, %v665_v18  ;;  %v663_v31 = vmul.f32 %v662_v24, %v637_v23 }
 0x152   : > { %v667_v28 = vmul.f32 %v917_v13, %v666_v22  ;;  %v699_v38 = vsel %vm696_vm9, %v663_v31, 0.0 }
 0x153   : > { %v702_v40 = vsel %vm701_vm11, %v699_v38, 0.0 }
 0x154   : > { %v668_v32 = vadd.f32 %v917_v13, %v667_v28 }
 0x156   : > { %v672_v35 = vsel %vm671_vm8, %v917_v13, %v668_v32 }
 0x157   : > { %v677_v36 = vsel %vm674_vm10, %v676_v33, %v672_v35 }
 0x158   : > { %v678_v37 = vmul.f32 %v677_v36, %v638_v34 }
 0x15a   : > { %v700_v39 = vsel %vm696_vm9, %v678_v37, 0.0 }
 0x15b   : > { %v703_v41 = vsel %vm701_vm11, %v700_v39, 0.0 }
 0x15c   : > { %v704_v42 = vadd.f32 %v703_v41, %v702_v40 }
 0x15e   : > { %705 = vadd.xlane.f32.xlu0 %v704_v42 }
 0x1d1   : > { %v706_v43 = vpop.xlane.xlu0 %705 }
 0x1d2   : > { %v707_v44 = vrot.slane %v706_v43, 4 }
 0x1d4   : > { %v708_v45 = vadd.f32 %v707_v44, %v706_v43 }
 0x1d6   : > { %v709_v46 = vrot.slane %v708_v45, 2 }
 0x1d8   : > { %v710_v47 = vadd.f32 %v709_v46, %v708_v45 }
 0x1da   : > { %v711_v48 = vrot.slane %v710_v47, 1 }
 0x1dc   : > { %v712_v49 = vadd.f32 %v711_v48, %v710_v47 }
 0x1de   : > { %888 = vpush %v712_v49 }
 0x20f   : > { %s889_s19 = spop %888 }
 0x210   : > { %v714_v50 = vstv %s889_s19 }
 0x211   : > { %716 = vst.msk [vmem:[%s304_s14] sm:$0x1] %vm715_vm12, %v714_v50 }
 0x212 PF: > { %s14_s17 = sadd.s32 1, %s940_s17   ;;  %s1078_s15 = smov %s936_s16 }
 0x213   : > { %p11_p5 = scmp.ge.s32.totalorder %s14_s17, 10   ;;  %s1079_s16 = smov %s1081_s18 }
 0x215   :  { %13 = sbr.rel (!%p11_p5) target bundleno = 2 (0x2), region = 69 }

</bundles_post_ra>
